<compile_context>
chip_gen: v6e
topology: v6e:2x2x1
jax: 0.10.0
libtpu: 0.0.40
codegen_flags: <defaults>
</compile_context>

<pallas_src>
import functools

import jax
import jax.numpy as jnp
from jax.experimental import pallas as pl
from jax.experimental.pallas import tpu as pltpu


def _round_up(v, m):
    return (v + m - 1) // m * m


def _actor_kernel(x_ref, w1_ref, b1_ref, w2_ref, b2_ref, o_ref, *, a_bound):
    # fc1: (TB, S) x (S, Hp) -> f32 accumulate on the MXU.  x is cast to bf16
    # in-kernel (no wrapper-side pad/cast pass over HBM); the small-K dot is
    # fine since compute is nowhere near the bottleneck here.
    h = jnp.dot(x_ref[...].astype(jnp.bfloat16), w1_ref[...],
                preferred_element_type=jnp.float32)
    # Bias + ReLU in f32 on the VPU (fast path on v5e); padded hidden lanes
    # stay exactly 0 through the ReLU.
    h = jnp.maximum(h + b1_ref[...], 0.0)
    # out layer: (TB, Hp) x (Hp, A) -> f32.
    y = jnp.dot(h.astype(jnp.bfloat16), w2_ref[...],
                preferred_element_type=jnp.float32)
    y = y + b2_ref[...]
    # tanh on the EUP, static action bound; unpadded (TB, A) store.
    o_ref[...] = (jnp.tanh(y) * a_bound).astype(o_ref.dtype)


def _choose_batch_tiling(batch, max_tile_b):
    """Batch tile / grid selection.

    - tiles divide the batch nearly evenly (<= 7 ghost rows total), instead of
      round_up(B, TB) which could waste up to TB-1 rows of DMA + compute;
    - >= 2 tiles whenever the batch is big enough, so the "parallel" grid axis
      can be sharded onto the second TensorCore on v7x;
    - tile as large as possible (default cap 4096) so the ~0.35us per-grid-step
      overhead is well amortized on every generation.
    """
    min_tiles = 2 if batch >= 16 else 1
    n_tiles = max(pl.cdiv(batch, max_tile_b), min_tiles)
    tile_b = _round_up(pl.cdiv(batch, n_tiles), 8)
    grid_b = pl.cdiv(batch, tile_b)   # partial last tile handled by Pallas
    return tile_b, grid_b


def simple_actor_net(x, w1, b1, w2, b2, a_bound, *, max_tile_b=4096):
    """Pallas forward pass of SimpleActorNet.

    x : (B, n_states) f32
    w1: (n_states, n_neurons) f32   (transposed torch fc1.weight)
    b1: (n_neurons,) f32
    w2: (n_neurons, n_actions) f32  (transposed torch out.weight)
    b2: (n_actions,) f32
    a_bound: python scalar action bound (static; a different bound recompiles).
    """
    B, S = x.shape
    H = w1.shape[1]
    A = w2.shape[1]

    # Only the hidden dim is padded (lane-dense intermediates); weights are
    # tiny and DMA'd once (constant index_map => VMEM-resident across grid).
    Hp = _round_up(H, 128)
    w1p = jnp.zeros((S, Hp), jnp.bfloat16).at[:, :H].set(w1.astype(jnp.bfloat16))
    b1p = jnp.zeros((1, Hp), jnp.float32).at[0, :H].set(b1.astype(jnp.float32))
    w2p = jnp.zeros((Hp, A), jnp.bfloat16).at[:H, :].set(w2.astype(jnp.bfloat16))
    b2p = b2.astype(jnp.float32).reshape(1, A)

    TB, grid_b = _choose_batch_tiling(B, max_tile_b)
    # VMEM footprint (double-buffered x/out tiles + resident weights + f32
    # intermediates) stays far under the 32 MiB scoped default at these sizes;
    # raise vmem_limit_bytes only if TB is pushed toward 8K+ with large S.

    flops = 2 * B * (S * Hp + Hp * A)
    bytes_accessed = (B * S * 4 + w1p.size * 2 + w2p.size * 2
                      + b1p.size * 4 + b2p.size * 4 + B * A * 4)

    return pl.pallas_call(
        functools.partial(_actor_kernel, a_bound=float(a_bound)),
        out_shape=jax.ShapeDtypeStruct((B, A), jnp.float32),
        grid_spec=pltpu.PrefetchScalarGridSpec(
            num_scalar_prefetch=0,
            grid=(grid_b,),
            in_specs=[
                pl.BlockSpec((TB, S), lambda i: (i, 0)),   # x: streamed, unpadded
                pl.BlockSpec((S, Hp), lambda i: (0, 0)),   # w1: VMEM-resident
                pl.BlockSpec((1, Hp), lambda i: (0, 0)),   # b1: VMEM-resident
                pl.BlockSpec((Hp, A), lambda i: (0, 0)),   # w2: VMEM-resident
                pl.BlockSpec((1, A), lambda i: (0, 0)),    # b2: VMEM-resident
            ],
            out_specs=pl.BlockSpec((TB, A), lambda i: (i, 0)),
        ),
        compiler_params=pltpu.CompilerParams(
            dimension_semantics=("parallel",),   # batch tiles -> both TCs on v7x
        ),
        cost_estimate=pl.CostEstimate(
            flops=flops,
            transcendentals=B * A,
            bytes_accessed=bytes_accessed,
        ),
    )(x.astype(jnp.float32), w1p, b1p, w2p, b2p)


def init_params(key, n_states, n_actions, n_neurons):
    """Init matching the torch module: weights ~ N(0, 0.1); default torch
    Linear biases ~ U(-1/sqrt(fan_in), +1/sqrt(fan_in))."""
    k1, k2, k3, k4 = jax.random.split(key, 4)
    w1 = 0.1 * jax.random.normal(k1, (n_states, n_neurons), jnp.float32)
    b1 = jax.random.uniform(
        k2, (n_neurons,), jnp.float32,
        minval=-1.0 / jnp.sqrt(float(n_states)),
        maxval=1.0 / jnp.sqrt(float(n_states)))
    w2 = 0.1 * jax.random.normal(k3, (n_neurons, n_actions), jnp.float32)
    b2 = jax.random.uniform(
        k4, (n_actions,), jnp.float32,
        minval=-1.0 / jnp.sqrt(float(n_neurons)),
        maxval=1.0 / jnp.sqrt(float(n_neurons)))
    return w1, b1, w2, b2


if __name__ == "__main__":
    # Small shapes consistent with the module (n_neurons defaults to 30 in the
    # torch code); batch=16 gives a 2-tile "parallel" batch grid.
    batch, n_states, n_actions, n_neurons = 16, 16, 8, 30
    a_bound = 2.0

    key = jax.random.PRNGKey(0)
    kx, kp = jax.random.split(key)
    x = jax.random.normal(kx, (batch, n_states), jnp.float32)
    w1, b1, w2, b2 = init_params(kp, n_states, n_actions, n_neurons)

    out = simple_actor_net(x, w1, b1, w2, b2, a_bound)
    out = jax.block_until_ready(out)

    # Plain-JAX f32 reference; tolerance covers the bf16 MXU operands (the
    # kernel is memory bound, so f32 matmuls could be swapped in at no
    # wall-clock cost if tighter parity were ever required).
    ref = jnp.tanh(jnp.maximum(x @ w1 + b1, 0.0) @ w2 + b2) * a_bound
    assert out.shape == (batch, n_actions)
    assert jnp.allclose(out, ref, atol=3e-2, rtol=3e-2), (
        f"max abs err = {jnp.max(jnp.abs(out - ref))}")
    print("KERNEL_OK")
</pallas_src>

<mosaic_0001>
module attributes {stable_mosaic.version = 11 : i64} {
  func.func @_actor_kernel(%arg0: i32, %arg1: memref<8x16xf32, #tpu.memory_space<vmem>>, %arg2: memref<16x128xbf16, #tpu.memory_space<vmem>>, %arg3: memref<1x128xf32, #tpu.memory_space<vmem>>, %arg4: memref<128x8xbf16, #tpu.memory_space<vmem>>, %arg5: memref<1x8xf32, #tpu.memory_space<vmem>>, %arg6: memref<8x8xf32, #tpu.memory_space<vmem>>) attributes {dimension_semantics = [#tpu.dimension_semantics<parallel>], iteration_bounds = array<i64: 2>, scalar_prefetch = 0 : i64, scratch_operands = 0 : i64, tpu.core_type = #tpu.core_type<tc>, window_params = [{transform_indices = @transform_0, window_bounds = array<i64: 8, 16>}, {pipeline_mode = #tpu.pipeline_mode<synchronous>, transform_indices = @transform_1, window_bounds = array<i64: 16, 128>}, {pipeline_mode = #tpu.pipeline_mode<synchronous>, transform_indices = @transform_2, window_bounds = array<i64: 1, 128>}, {pipeline_mode = #tpu.pipeline_mode<synchronous>, transform_indices = @transform_3, window_bounds = array<i64: 128, 8>}, {pipeline_mode = #tpu.pipeline_mode<synchronous>, transform_indices = @transform_4, window_bounds = array<i64: 1, 8>}, {transform_indices = @transform_5, window_bounds = array<i64: 8, 8>}]} {
    %c0 = arith.constant 0 : index
    %c0_0 = arith.constant 0 : index
    %0 = vector.load %arg1[%c0, %c0_0] : memref<8x16xf32, #tpu.memory_space<vmem>>, vector<8x16xf32>
    %1 = arith.truncf %0 : vector<8x16xf32> to vector<8x16xbf16>
    %c0_1 = arith.constant 0 : index
    %c0_2 = arith.constant 0 : index
    %2 = vector.load %arg2[%c0_1, %c0_2] : memref<16x128xbf16, #tpu.memory_space<vmem>>, vector<16x128xbf16>
    %cst = arith.constant dense<0.000000e+00> : vector<8x128xf32>
    %3 = tpu.matmul %1, %2, %cst {dimension_numbers = #tpu.dot_dimension_numbers<[1], [0], [0], [1], [0, 0, 1, 1], [], []>} : vector<8x16xbf16>, vector<16x128xbf16>, vector<8x128xf32> -> vector<8x128xf32>
    %c0_3 = arith.constant 0 : index
    %c0_4 = arith.constant 0 : index
    %4 = vector.load %arg3[%c0_3, %c0_4] : memref<1x128xf32, #tpu.memory_space<vmem>>, vector<1x128xf32>
    %5 = vector.broadcast %4 : vector<1x128xf32> to vector<8x128xf32>
    %6 = arith.addf %3, %5 : vector<8x128xf32>
    %cst_5 = arith.constant 0.000000e+00 : f32
    %7 = vector.broadcast %cst_5 : f32 to vector<8x128xf32>
    %8 = arith.maximumf %6, %7 : vector<8x128xf32>
    %9 = arith.truncf %8 : vector<8x128xf32> to vector<8x128xbf16>
    %c0_6 = arith.constant 0 : index
    %c0_7 = arith.constant 0 : index
    %10 = vector.load %arg4[%c0_6, %c0_7] : memref<128x8xbf16, #tpu.memory_space<vmem>>, vector<128x8xbf16>
    %cst_8 = arith.constant dense<0.000000e+00> : vector<8x8xf32>
    %11 = tpu.matmul %9, %10, %cst_8 {dimension_numbers = #tpu.dot_dimension_numbers<[1], [0], [0], [1], [0, 0, 1, 1], [], []>} : vector<8x128xbf16>, vector<128x8xbf16>, vector<8x8xf32> -> vector<8x8xf32>
    %c0_9 = arith.constant 0 : index
    %c0_10 = arith.constant 0 : index
    %12 = vector.load %arg5[%c0_9, %c0_10] : memref<1x8xf32, #tpu.memory_space<vmem>>, vector<1x8xf32>
    %13 = vector.broadcast %12 : vector<1x8xf32> to vector<8x8xf32>
    %14 = arith.addf %11, %13 : vector<8x8xf32>
    %15 = math.tanh %14 : vector<8x8xf32>
    %cst_11 = arith.constant 2.000000e+00 : f32
    %16 = vector.broadcast %cst_11 : f32 to vector<8x8xf32>
    %17 = arith.mulf %15, %16 : vector<8x8xf32>
    %c0_12 = arith.constant 0 : index
    %c0_13 = arith.constant 0 : index
    %18 = vector.load %arg6[%c0_12, %c0_13] : memref<8x8xf32, #tpu.memory_space<vmem>>, vector<8x8xf32>
    tpu.vector_store %arg6[%c0_12, %c0_13], %17 {strides = array<i32>} : memref<8x8xf32, #tpu.memory_space<vmem>>, vector<8x8xf32>,
    return
  }
  func.func @transform_0(%arg0: i32) -> (i32, i32) {
    %c0_i32 = arith.constant 0 : i32
    %c0_i32_0 = arith.constant 0 : i32
    return %arg0, %c0_i32 : i32, i32
  }
  func.func @transform_1(%arg0: i32) -> (i32, i32) {
    %c0_i32 = arith.constant 0 : i32
    %c0_i32_0 = arith.constant 0 : i32
    %c0_i32_1 = arith.constant 0 : i32
    return %c0_i32, %c0_i32_0 : i32, i32
  }
  func.func @transform_2(%arg0: i32) -> (i32, i32) {
    %c0_i32 = arith.constant 0 : i32
    %c0_i32_0 = arith.constant 0 : i32
    %c0_i32_1 = arith.constant 0 : i32
    return %c0_i32, %c0_i32_0 : i32, i32
  }
  func.func @transform_3(%arg0: i32) -> (i32, i32) {
    %c0_i32 = arith.constant 0 : i32
    %c0_i32_0 = arith.constant 0 : i32
    %c0_i32_1 = arith.constant 0 : i32
    return %c0_i32, %c0_i32_0 : i32, i32
  }
  func.func @transform_4(%arg0: i32) -> (i32, i32) {
    %c0_i32 = arith.constant 0 : i32
    %c0_i32_0 = arith.constant 0 : i32
    %c0_i32_1 = arith.constant 0 : i32
    return %c0_i32, %c0_i32_0 : i32, i32
  }
  func.func @transform_5(%arg0: i32) -> (i32, i32) {
    %c0_i32 = arith.constant 0 : i32
    %c0_i32_0 = arith.constant 0 : i32
    return %arg0, %c0_i32 : i32, i32
  }
}

</mosaic_0001>

<bundles_post_ra>
// kernel: tpu_custom_call.1
= control target key start
LH: loop header
LB: loop body
LE: loop exit
PB: predicated region body
PF: predicated region fallthrough
CT: control target
= control target key end

     0   :  { %s571_s18 = smov 0   ;;  %s628_s0 = inlined_call_operand.vmem [shape: f32[16,16], index: 0, kind: input, shape index: {}]   ;;  %s629_s1 = inlined_call_operand.vmem [shape: bf16[16,128], index: 1, kind: input, shape index: {}]   ;;  %s630_s2 = inlined_call_operand.vmem [shape: f32[1,128], index: 2, kind: input, shape index: {}]   ;;  %s631_s3 = inlined_call_operand.vmem [shape: bf16[128,8], index: 3, kind: input, shape index: {}]   ;;  %s632_s4 = inlined_call_operand.vmem [shape: f32[1,8], index: 4, kind: input, shape index: {}]   ;;  %s633_s5 = inlined_call_operand.vmem [shape: f32[16,8], index: 5, kind: output, shape index: {}]  }
   0x1 LB: > { %s452_s19 = sadd.s32 4294967295, %s537_s18   ;;  %p456_p0 = scmp.ge.s32.totalorder %s537_s18, 1  ;;  %s537_s18 = sphi %s571_s18, %s15_s18  }
   0x2   : > { %p186_p1 = scmp.lt.s32.totalorder %s537_s18, 3 }
   0x4   : > { %p187_p2 = pnand %p456_p0, %p186_p1 }
   0x5   : > { %p212_p3 = scmp.lt.s32.totalorder (!%p187_p2), %s452_s19, 1 }
   0x6   : > { %190 = sbr.rel (%p187_p2) target bundleno = 428 (0x1ac), region = 40 }
   0xb   : > { %v520_v0 = vld [vmem:[%s629_s1] sm:$0xff]   ;;  %v539_v1 = vmov 0.0   ;;  %v521_v2 = vld [vmem:[%s631_s3 + $0x38] sm:$0xff]   ;;  %vm540_vm0 = vmmov 0   ;;  %s635_s19 = smov (!%p212_p3, %s452_s19), 1  ;;  %v522_v3 = vld [vmem:[%s631_s3 + $0x30] sm:$0xff]  }
   0xc   : > { %484 = vmatprep.subr.bf16.mxu0 %v539_v1  ;;  %490 = vmatprep.subr.bf16.mxu1 %v539_v1  ;;  %s457_s26 = sshll.u32 %s635_s19, 3  ;;  %vm238_vm1 = vcmask 130048   ;;  %v523_v5 = vld [vmem:[%s631_s3 + $0x28] sm:$0xff]   ;;  %v524_v7 = vld [vmem:[%s631_s3 + $0x20] sm:$0xff]   ;;  %v525_v8 = vld [vmem:[%s631_s3 + $0x18] sm:$0xff]   ;;  %vm397_vm2 = vcmask 64512  }
   0xd   : > { %485 = vmatpush3.bf16.msra.mxu0 %v520_v0  ;;  %486 = vmatprep.mubr.msk.bf16.mxu0 %vm540_vm0, %v539_v1  ;;  %s215_s29 = scalar_lea.vmem %s628_s0, %s457_s26  ;;  %v526_v9 = vld [vmem:[%s631_s3 + $0x10] sm:$0xff]   ;;  %v527_v10 = vld [vmem:[%s631_s3 + $0x8] sm:$0xff]   ;;  %v528_v11 = vld [vmem:[%s631_s3] sm:$0xff]   ;;  %s219_s25 = scalar_lea.vmem %s633_s5, %s457_s26 }
   0xe   : > { %491 = vmatpush3.bf16.msra.mxu1 %v521_v2  ;;  %506 = vmatprep.mubr.msk.bf16.mxu1 %vm540_vm0, %v539_v1  ;;  %v221_v4 = vld [vmem:[%s215_s29] sm:$0xff] }
   0xf   : > { %492 = vmatprep.subr.bf16.mxu1 %v539_v1  ;;  %v222_v6 = vpack.c.bf16 %v221_v4, %v221_v4  ;;  %v459_v12 = vld [vmem:[%s630_s2] ss:$0 sm:$0xff] }
  0x10   : > { %v462_v20 = vld [vmem:[%s632_s4] ss:$0 sm:$0xff] }
  0x11   : > { %487 = vmatmul.mubr.msk.bf16.vlgmr.msra.gmra.mxu0 %vm238_vm1, %v222_v6 }
  0x12   : > { %493 = vmatpush3.bf16.msra.mxu1 %v522_v3 }
  0x13   : > { %494 = vmatprep.subr.bf16.mxu1 %v539_v1 }
  0x16   : > { %495 = vmatpush3.bf16.msra.mxu1 %v523_v5 }
  0x17   : > { %496 = vmatprep.subr.bf16.mxu1 %v539_v1 }
  0x1a   : > { %497 = vmatpush3.bf16.msra.mxu1 %v524_v7 }
  0x1b   : > { %498 = vmatprep.subr.bf16.mxu1 %v539_v1 }
  0x1e   : > { %499 = vmatpush3.bf16.msra.mxu1 %v525_v8 }
  0x1f   : > { %500 = vmatprep.subr.bf16.mxu1 %v539_v1 }
  0x22   : > { %501 = vmatpush3.bf16.msra.mxu1 %v526_v9 }
  0x23   : > { %502 = vmatprep.subr.bf16.mxu1 %v539_v1 }
  0x26   : > { %503 = vmatpush3.bf16.msra.mxu1 %v527_v10 }
  0x27   : > { %504 = vmatprep.subr.bf16.mxu1 %v539_v1 }
  0x2a   : > { %505 = vmatpush3.bf16.msra.mxu1 %v528_v11 }
  0xd1   : > { %v276_v13 = vpop.f32.mrf.mxu0 }
  0xd2   : > { %v277_v14 = vadd.f32 %v459_v12, %v276_v13 }
  0xd3   : > { %v488_v15 = vpop.f32.mrf.mxu0 }
  0xd4   : > { %v282_v16 = vmax.f32 %v277_v14, 0.0 }
  0xd5   : > { %v279_v17 = vpop.f32.mrf.mxu0 }
  0xd6   : > { %v283_v18 = vpack.c.bf16 %v282_v16, %v282_v16 }
  0xd7   : > { %v489_v19 = vpop.f32.mrf.mxu0 }
  0xd8   : > { %507 = vmatmul.mubr.bf16.vlgmr.msra.gmra.mxu1 %v283_v18 }
 0x198   : > { %v389_v21 = vpop.f32.mrf.mxu1 }
 0x199   : > { %v390_v22 = vadd.f32 %v462_v20, %v389_v21 }
 0x19a   : > { %v508_v23 = vpop.f32.mrf.mxu1 }
 0x19b   : > { %529 = vtanh.f32 %v390_v22 }
 0x19c   : > { %v392_v24 = vpop.f32.mrf.mxu1 }
 0x19e   : > { %v509_v25 = vpop.f32.mrf.mxu1 }
 0x1a8   : > { %v530_v26 = vpop.eup %529 }
 0x1a9   : > { %v396_v27 = vmul.f32 2.0, %v530_v26 }
 0x1ab   : > { %398 = vst.msk [vmem:[%s219_s25] sm:$0xff] %vm397_vm2, %v396_v27 }
 0x1ac PF: > { %s15_s18 = sadd.s32 1, %s537_s18  }
 0x1ad   : > { %p12_p4 = scmp.ge.s32.totalorder %s15_s18, 4  }
 0x1af   :  { %14 = sbr.rel (!%p12_p4) target bundleno = 1 (0x1), region = 70 }

</bundles_post_ra>
